<compile_context>
chip_gen: v7x
topology: tpu7x:2x2x1
jax: 0.10.0
libtpu: 0.0.40
codegen_flags: <defaults>
</compile_context>

<pallas_src>
import functools

import jax
import jax.numpy as jnp
from jax.experimental import pallas as pl
from jax.experimental.pallas import tpu as pltpu


def _cat_kernel(*refs, dims):
    """refs = (*in_refs, out_ref). Copies each input into its column slice."""
    out_ref = refs[-1]
    in_refs = refs[:-1]
    off = 0
    for in_ref, d in zip(in_refs, dims):
        # Static column slice (offsets are Python ints at trace time).
        out_ref[:, off:off + d] = in_ref[...]
        off += d


def _pick_row_tile(rows, total_d, itemsize, *, target=512,
                   vmem_budget=24 * 1024 * 1024):
    """Choose a row tile: dtype-aware sublane multiple, bounded by VMEM budget."""
    # Sub-32-bit dtypes pack along sublanes: f32 -> 8, bf16 -> 16, int8/fp8 -> 32.
    sub = {4: 8, 2: 16, 1: 32}.get(itemsize, 8)
    if rows < sub:
        # Tiny input: a single full-extent block is always legal.
        return rows
    # Double-buffered inputs (tr * total_d) + double-buffered output (tr * total_d)
    # ~= 4 * tr * total_d * itemsize must fit the budget.
    cap = max(sub, vmem_budget // (4 * total_d * itemsize))
    tr = min(target, cap, rows)
    tr = max(sub, (tr // sub) * sub)
    return tr


def cat_last_dim(inputs, *, row_tile=512):
    """Concatenate arrays along the last dimension via a Pallas TPU kernel.

    All inputs must share leading dims and dtype (mirrors torch.cat semantics
    for same-dtype tensors). Accepts a list/tuple or a dict (values are used,
    in insertion order, like the reference module).
    """
    if isinstance(inputs, dict):
        inputs = list(inputs.values())
    inputs = list(inputs)
    assert len(inputs) >= 1
    lead_shape = inputs[0].shape[:-1]
    dtype = inputs[0].dtype
    for x in inputs:
        assert x.shape[:-1] == lead_shape, "leading dims must match"
        assert x.dtype == dtype, "dtypes must match"

    dims = tuple(int(x.shape[-1]) for x in inputs)
    total_d = sum(dims)
    itemsize = jnp.dtype(dtype).itemsize

    # Flatten leading dims -> rows.
    rows = 1
    for s in lead_shape:
        rows *= int(s)
    flat_inputs = [x.reshape(rows, d) for x, d in zip(inputs, dims)]

    tr = _pick_row_tile(rows, total_d, itemsize, target=row_tile)
    grid = (pl.cdiv(rows, tr),)  # partial last block is masked on write-back

    in_specs = [pl.BlockSpec((tr, d), lambda i: (i, 0)) for d in dims]
    out_spec = pl.BlockSpec((tr, total_d), lambda i: (i, 0))

    kernel = functools.partial(_cat_kernel, dims=dims)

    bytes_accessed = 2 * rows * total_d * itemsize  # read everything + write once
    out_flat = pl.pallas_call(
        kernel,
        out_shape=jax.ShapeDtypeStruct((rows, total_d), dtype),
        grid=grid,
        in_specs=in_specs,
        out_specs=out_spec,
        compiler_params=pltpu.CompilerParams(
            dimension_semantics=("parallel",),
            vmem_limit_bytes=48 * 1024 * 1024,
        ),
        cost_estimate=pl.CostEstimate(
            flops=0, transcendentals=0, bytes_accessed=bytes_accessed),
    )(*flat_inputs)

    return out_flat.reshape(*lead_shape, total_d)


if __name__ == "__main__":
    key = jax.random.PRNGKey(0)
    k1, k2, k3, k4, k5 = jax.random.split(key, 5)

    # Small shapes consistent with the module: batch=2, seq=8, varying hidden.
    a = jax.random.normal(k1, (2, 8, 32), dtype=jnp.float32)
    b = jax.random.normal(k2, (2, 8, 48), dtype=jnp.float32)
    c = jax.random.normal(k3, (2, 8, 16), dtype=jnp.float32)

    out = cat_last_dim([a, b, c])
    out = jax.block_until_ready(out)
    ref = jnp.concatenate([a, b, c], axis=-1)
    assert out.shape == (2, 8, 96), out.shape
    assert jnp.array_equal(out, ref), "mismatch vs jnp.concatenate (small case)"

    # Dict input + non-divisible row count (exercises the partial last block
    # and the multi-step pipelined grid).
    d1 = jax.random.normal(k4, (4, 260, 128), dtype=jnp.float32)
    d2 = jax.random.normal(k5, (4, 260, 64), dtype=jnp.float32)
    out2 = cat_last_dim({"x": d1, "y": d2})
    out2 = jax.block_until_ready(out2)
    ref2 = jnp.concatenate([d1, d2], axis=-1)
    assert out2.shape == (4, 260, 192), out2.shape
    assert jnp.array_equal(out2, ref2), "mismatch vs jnp.concatenate (ragged rows)"

    print("KERNEL_OK")
</pallas_src>

<mosaic_0001>
module attributes {stable_mosaic.version = 11 : i64} {
  func.func @_cat_kernel(%arg0: i32, %arg1: memref<16x32xf32, #tpu.memory_space<vmem>>, %arg2: memref<16x48xf32, #tpu.memory_space<vmem>>, %arg3: memref<16x16xf32, #tpu.memory_space<vmem>>, %arg4: memref<16x96xf32, #tpu.memory_space<vmem>>) attributes {dimension_semantics = [#tpu.dimension_semantics<parallel>], iteration_bounds = array<i64: 1>, scalar_prefetch = 0 : i64, scratch_operands = 0 : i64, tpu.core_type = #tpu.core_type<tc>, window_params = [{transform_indices = @transform_0, window_bounds = array<i64: 16, 32>}, {transform_indices = @transform_1, window_bounds = array<i64: 16, 48>}, {transform_indices = @transform_2, window_bounds = array<i64: 16, 16>}, {transform_indices = @transform_3, window_bounds = array<i64: 16, 96>}]} {
    %c0 = arith.constant 0 : index
    %c0_0 = arith.constant 0 : index
    %0 = vector.load %arg1[%c0, %c0_0] : memref<16x32xf32, #tpu.memory_space<vmem>>, vector<16x32xf32>
    %c0_1 = arith.constant 0 : index
    %c0_2 = arith.constant 0 : index
    %1 = vector.load %arg4[%c0_1, %c0_2] : memref<16x96xf32, #tpu.memory_space<vmem>>, vector<16x32xf32>
    tpu.vector_store %arg4[%c0_1, %c0_2], %0 {strides = array<i32>} : memref<16x96xf32, #tpu.memory_space<vmem>>, vector<16x32xf32>,
    %c0_3 = arith.constant 0 : index
    %c0_4 = arith.constant 0 : index
    %2 = vector.load %arg2[%c0_3, %c0_4] : memref<16x48xf32, #tpu.memory_space<vmem>>, vector<16x48xf32>
    %c0_5 = arith.constant 0 : index
    %c32 = arith.constant 32 : index
    %3 = vector.load %arg4[%c0_5, %c32] : memref<16x96xf32, #tpu.memory_space<vmem>>, vector<16x48xf32>
    tpu.vector_store %arg4[%c0_5, %c32], %2 {strides = array<i32>} : memref<16x96xf32, #tpu.memory_space<vmem>>, vector<16x48xf32>,
    %c0_6 = arith.constant 0 : index
    %c0_7 = arith.constant 0 : index
    %4 = vector.load %arg3[%c0_6, %c0_7] : memref<16x16xf32, #tpu.memory_space<vmem>>, vector<16x16xf32>
    %c0_8 = arith.constant 0 : index
    %c80 = arith.constant 80 : index
    %5 = vector.load %arg4[%c0_8, %c80] : memref<16x96xf32, #tpu.memory_space<vmem>>, vector<16x16xf32>
    tpu.vector_store %arg4[%c0_8, %c80], %4 {strides = array<i32>} : memref<16x96xf32, #tpu.memory_space<vmem>>, vector<16x16xf32>,
    return
  }
  func.func @transform_0(%arg0: i32) -> (i32, i32) {
    %c0_i32 = arith.constant 0 : i32
    %c0_i32_0 = arith.constant 0 : i32
    return %arg0, %c0_i32 : i32, i32
  }
  func.func @transform_1(%arg0: i32) -> (i32, i32) {
    %c0_i32 = arith.constant 0 : i32
    %c0_i32_0 = arith.constant 0 : i32
    return %arg0, %c0_i32 : i32, i32
  }
  func.func @transform_2(%arg0: i32) -> (i32, i32) {
    %c0_i32 = arith.constant 0 : i32
    %c0_i32_0 = arith.constant 0 : i32
    return %arg0, %c0_i32 : i32, i32
  }
  func.func @transform_3(%arg0: i32) -> (i32, i32) {
    %c0_i32 = arith.constant 0 : i32
    %c0_i32_0 = arith.constant 0 : i32
    return %arg0, %c0_i32 : i32, i32
  }
}

</mosaic_0001>

<bundles_post_ra>
// kernel: tpu_custom_call.1
= control target key start
LH: loop header
LB: loop body
LE: loop exit
PB: predicated region body
PF: predicated region fallthrough
CT: control target
= control target key end

     0   :  { %8 = vsyncpa [#allocation3], 0  ;;  %s302_s0 = inlined_call_operand.hbm [shape: f32[16,32], index: 0, kind: input, shape index: {}]   ;;  %s303_s1 = inlined_call_operand.hbm [shape: f32[16,48], index: 1, kind: input, shape index: {}]   ;;  %s304_s2 = inlined_call_operand.hbm [shape: f32[16,16], index: 2, kind: input, shape index: {}]   ;;  %s305_s3 = inlined_call_operand.hbm [shape: f32[16,96], index: 3, kind: output, shape index: {}]  }
   0x1   :  { %9 = vsyncpa [#allocation6], 0 }
   0x2   :  { %10 = vsyncpa [#allocation4], 0  ;;  %s207_s12 = smov [#allocation5]   ;;  %s208_s14 = smov [#allocation2]  }
   0x3   :  { %s28_s13 = sshll.u32 %s207_s12, 4  ;;  %s16_s15 = sshll.u32 %s208_s14, 4  ;;  %s29_s13 = int_to_ptr.vmem [resolvable:$true] %s28_s13  ;;  %s235_s15 = int_to_ptr.vmem [resolvable:$true] %s16_s15 }
   0x4   :  { %s113_s18 = scalar_lea.hbm %s303_s1, 256 }
   0x5   :  { %p114_p0 = scmp.ne.s32.totalorder %s303_s1, %s113_s18  ;;  %p117_p1 = scmp.lt.u32.totalorder %s113_s18, %s303_s1 }
   0x7   :  { %p119_p2 = pnand %p117_p1, %p114_p0 }
   0x9   :  { %122 = shalt.err (!%p119_p2)
}
   0xa   :  { %s123_s23 = scalar_lea.vmem %s29_s13, 256  ;;  %p128_p4 = scmp.lt.s32.totalorder %s29_s13, %s29_s13 }
   0xb   :  { %p124_p3 = scmp.ne.s32.totalorder %s29_s13, %s123_s23  ;;  %p129_p5 = scmp.lt.s32.totalorder %s123_s23, %s123_s23 }
   0xd   :  { %p130_p6 = por %p129_p5, %p128_p4 }
   0xf   :  { %p131_p7 = pnand %p130_p6, %p124_p3 }
  0x11   :  { %134 = shalt.err (!%p131_p7)
}
  0x12   :  { %s209_s24 = smov 128   ;;  %s210_s25 = smov 8  }
  0x13   :  { %34 = dma.hbm_to_vmem [thread:$0]  %s303_s1, 256, %s29_s13, [#allocation6], %s209_s24, %s209_s24, %s210_s25  }
  0x14   :  { %s135_s30 = scalar_lea.hbm %s302_s0, 256 }
  0x15   :  { %p136_p8 = scmp.ne.s32.totalorder %s302_s0, %s135_s30  ;;  %p139_p9 = scmp.lt.u32.totalorder %s135_s30, %s302_s0 }
  0x17   :  { %p141_p10 = pnand %p139_p9, %p136_p8 }
  0x19   :  { %144 = shalt.err (!%p141_p10)
}
  0x1a   :  { %s145_s8 = scalar_lea.vmem %s235_s15, 256  ;;  %p150_p12 = scmp.lt.s32.totalorder %s235_s15, %s235_s15 }
  0x1b   :  { %p146_p11 = scmp.ne.s32.totalorder %s235_s15, %s145_s8  ;;  %p151_p13 = scmp.lt.s32.totalorder %s145_s8, %s145_s8 }
  0x1d   :  { %p152_p0 = por %p151_p13, %p150_p12 }
  0x1f   :  { %p153_p1 = pnand %p152_p0, %p146_p11 }
  0x21   :  { %156 = shalt.err (!%p153_p1)
}
  0x22   :  { %22 = dma.hbm_to_vmem [thread:$0]  %s302_s0, 256, %s235_s15, [#allocation3], %s209_s24, %s209_s24, %s210_s25  }
  0x23   :  { %s211_s10 = smov [#allocation7]   ;;  %s157_s14 = scalar_lea.hbm %s304_s2, 256 }
  0x24   :  { %s40_s11 = sshll.u32 %s211_s10, 4  ;;  %p158_p2 = scmp.ne.s32.totalorder %s304_s2, %s157_s14  ;;  %s41_s11 = int_to_ptr.vmem [resolvable:$true] %s40_s11 }
  0x25   :  { %p161_p3 = scmp.lt.u32.totalorder %s157_s14, %s304_s2 }
  0x27   :  { %p163_p4 = pnand %p161_p3, %p158_p2 }
  0x29   :  { %166 = shalt.err (!%p163_p4)
}
  0x2a   :  { %s167_s20 = scalar_lea.vmem %s41_s11, 256  ;;  %p172_p6 = scmp.lt.s32.totalorder %s41_s11, %s41_s11 }
  0x2b   :  { %p168_p5 = scmp.ne.s32.totalorder %s41_s11, %s167_s20  ;;  %p173_p7 = scmp.lt.s32.totalorder %s167_s20, %s167_s20 }
  0x2d   :  { %p174_p8 = por %p173_p7, %p172_p6 }
  0x2f   :  { %p175_p9 = pnand %p174_p8, %p168_p5 }
  0x31   :  { %178 = shalt.err (!%p175_p9)
}
  0x32   :  { %46 = dma.hbm_to_vmem [thread:$0]  %s304_s2, 256, %s41_s11, [#allocation6], %s209_s24, %s209_s24, %s210_s25  }
  0x33   :  { %201 = dma.done.wait [#allocation3], 256  }
  0x34   :  { %202 = vsyncadd [#allocation3], 4294967040 }
  0x35   :  { %203 = dma.done.wait [#allocation6], 512  }
  0x36   :  { %204 = vsyncadd [#allocation6], 4294966784  ;;  %vm58_vm0 = vcmask 261120   ;;  %v61_v0 = vld [vmem:[#allocation5] sm:$0xff]  ;;  %v74_v1 = vld [vmem:[#allocation7] sm:$0xff]  ;;  %s212_s21 = smov 32  }
  0x37   :  { %65 = vrot.lane.b32.xlu0 %v61_v0, %s212_s21  ;;  %s213_s22 = smov 80   ;;  %v56_v2 = vld [vmem:[#allocation2] sm:$0xff]  ;;  %v57_v3 = vld [vmem:[#allocation2 + $0x8] sm:$0xff]  ;;  %v62_v4 = vld [vmem:[#allocation5 + $0x8] sm:$0xff]  ;;  %vm71_vm1 = vcmask 654592   ;;  %vm84_vm2 = vcmask 786048  }
  0x38   :  { %78 = vrot.lane.b32.xlu1 %v74_v1, %s213_s22  ;;  %v75_v5 = vld [vmem:[#allocation7 + $0x8] sm:$0xff]  ;;  %59 = vst.msk [vmem:[#allocation8] sm:$0xff] %vm58_vm0, %v56_v2  ;;  %60 = vst.msk [vmem:[#allocation8 + $0x8] sm:$0xff] %vm58_vm0, %v57_v3  ;;  %s214_s2 = smov [#allocation8]  }
  0x39   :  { %s92_s23 = sshll.u32 %s214_s2, 4  ;;  %s93_s23 = int_to_ptr.vmem [resolvable:$true] %s92_s23 }
  0x3a   :  { %s179_s26 = scalar_lea.vmem %s93_s23, 256  ;;  %p184_p11 = scmp.lt.s32.totalorder %s93_s23, %s93_s23 }
  0x3b   :  { %67 = vrot.lane.b32.xlu0 %v62_v4, %s212_s21  ;;  %p180_p10 = scmp.ne.s32.totalorder %s93_s23, %s179_s26  ;;  %p185_p12 = scmp.lt.s32.totalorder %s179_s26, %s179_s26 }
  0x3c   :  { %80 = vrot.lane.b32.xlu1 %v75_v5, %s213_s22 }
  0x3d   :  { %p186_p13 = por %p185_p12, %p184_p11 }
  0x3f   :  { %p187_p0 = pnand %p186_p13, %p180_p10 }
  0xa9   :  { %v66_v6 = vpop.permute.xlu0 %65 }
  0xaa   :  { %v79_v7 = vpop.permute.xlu1 %78  ;;  %72 = vst.msk [vmem:[#allocation8] sm:$0xff] %vm71_vm1, %v66_v6 }
  0xab   :  { %85 = vst.msk [vmem:[#allocation8] sm:$0xff] %vm84_vm2, %v79_v7 }
  0xad   :  { %v68_v8 = vpop.permute.xlu0 %67 }
  0xae   :  { %v81_v9 = vpop.permute.xlu1 %80  ;;  %73 = vst.msk [vmem:[#allocation8 + $0x8] sm:$0xff] %vm71_vm1, %v68_v8 }
  0xaf   :  { %86 = vst.msk [vmem:[#allocation8 + $0x8] sm:$0xff] %vm84_vm2, %v81_v9 }
  0xb0   :  { %190 = shalt.err (!%p187_p0)
}
  0xb1   :  { %s191_s29 = scalar_lea.hbm %s305_s3, 256 }
  0xb2   :  { %p192_p1 = scmp.ne.s32.totalorder %s305_s3, %s191_s29  ;;  %p195_p2 = scmp.lt.u32.totalorder %s191_s29, %s305_s3 }
  0xb4   :  { %p197_p3 = pnand %p195_p2, %p192_p1 }
  0xb6   :  { %200 = shalt.err (!%p197_p3)
}
  0xb7   :  { %98 = dma.vmem_to_hbm [thread:$0]  %s93_s23, 256, %s305_s3, [#allocation4], %s209_s24, %s209_s24, %s210_s25  }
  0xb8   :  { %205 = dma.done.wait [#allocation4], 256  }
  0xb9   :  { %206 = vsyncadd [#allocation4], 4294967040 }
  0xba   :  { %102 = vsyncpa [#allocation3], 1 }
  0xbb   :  { %103 = vsyncpa [#allocation6], 1 }
  0xbc   :  { %104 = vsyncpa [#allocation4], 1 }

</bundles_post_ra>
